<compile_context>
chip_gen: v7x
topology: tpu7x:2x2x1
jax: 0.10.0
libtpu: 0.0.40
codegen_flags: <defaults>
</compile_context>

<pallas_src>
import functools

import jax
import jax.numpy as jnp
from jax.experimental import pallas as pl
from jax.experimental.pallas import tpu as pltpu


def _sq_diff_partial_kernel(pred_ref, gt_ref, out_ref, *, n_rows, row_tile):
    """One grid step: partial sum-of-squared-diff over a (row_tile, C) slab.

    pred_ref / gt_ref : (row_tile, C) VMEM tiles of the flattened inputs
    out_ref           : (1, C) VMEM tile of the per-tile partial sums
    """
    i = pl.program_id(0)

    diff = pred_ref[...].astype(jnp.float32) - gt_ref[...].astype(jnp.float32)
    sq = diff * diff

    # Mask rows beyond the true row count (last tile may be padded by Pallas).
    row_ids = i * row_tile + jax.lax.broadcasted_iota(jnp.int32, sq.shape, 0)
    sq = jnp.where(row_ids < n_rows, sq, jnp.float32(0.0))

    # Sublane reduction only (XLU); cheap and hidden under the DMA stream.
    out_ref[...] = jnp.sum(sq, axis=0, keepdims=True)


def joints_mse_loss(output, target, *, tile_bytes=2 * 1024 * 1024):
    """output, target: (B, J, H, W) arrays (NCHW, like PyTorch)."""
    B, J, H, W = output.shape
    C = H * W
    R = B * J

    # Contiguous flatten only — no transpose, no extra HBM pass.
    pred = output.reshape(R, C)
    gt = target.reshape(R, C)

    # Row tile sized to ~tile_bytes of f32 per input, multiple of 8 sublanes.
    bytes_per_row = C * 4
    rt = max(8, (tile_bytes // bytes_per_row) // 8 * 8)
    if rt >= R:
        rt = R  # single full-extent tile (always a legal block shape)
    num_tiles = pl.cdiv(R, rt)

    kernel = functools.partial(_sq_diff_partial_kernel, n_rows=R, row_tile=rt)

    partials = pl.pallas_call(
        kernel,
        out_shape=jax.ShapeDtypeStruct((num_tiles, C), jnp.float32),
        grid_spec=pltpu.PrefetchScalarGridSpec(
            num_scalar_prefetch=0,
            grid=(num_tiles,),
            in_specs=[
                pl.BlockSpec((rt, C), lambda i: (i, 0)),
                pl.BlockSpec((rt, C), lambda i: (i, 0)),
            ],
            # One distinct lane-dense output block per grid step -> no shared
            # accumulator -> safe to mark the grid axis "parallel".
            out_specs=pl.BlockSpec((1, C), lambda i: (i, 0)),
        ),
        compiler_params=pltpu.CompilerParams(
            dimension_semantics=("parallel",)),
    )(pred, gt)

    # Tiny final reduction + single fused scale (0.5 / (J * B * H * W)).
    scale = jnp.float32(0.5 / (B * J * H * W))
    return jnp.sum(partials) * scale


if __name__ == "__main__":
    key = jax.random.PRNGKey(0)
    k1, k2 = jax.random.split(key)

    B, J, H, W = 2, 4, 16, 16
    output = jax.random.normal(k1, (B, J, H, W), dtype=jnp.float32)
    target = jax.random.normal(k2, (B, J, H, W), dtype=jnp.float32)

    loss = joints_mse_loss(output, target)
    jax.block_until_ready(loss)

    # Reference: per-joint 0.5*mean summed and divided by J == 0.5*global mean.
    ref = 0.5 * jnp.mean((output - target) ** 2)
    assert jnp.allclose(loss, ref, rtol=1e-5, atol=1e-6), (loss, ref)

    print("KERNEL_OK")
</pallas_src>

<mosaic_0001>
module attributes {stable_mosaic.version = 11 : i64} {
  func.func @_sq_diff_partial_kernel(%arg0: i32, %arg1: memref<8x256xf32, #tpu.memory_space<vmem>>, %arg2: memref<8x256xf32, #tpu.memory_space<vmem>>, %arg3: memref<1x256xf32, #tpu.memory_space<vmem>>) attributes {dimension_semantics = [#tpu.dimension_semantics<parallel>], iteration_bounds = array<i64: 1>, scalar_prefetch = 0 : i64, scratch_operands = 0 : i64, tpu.core_type = #tpu.core_type<tc>, window_params = [{transform_indices = @transform_0, window_bounds = array<i64: 8, 256>}, {transform_indices = @transform_1, window_bounds = array<i64: 8, 256>}, {transform_indices = @transform_2, window_bounds = array<i64: 1, 256>}]} {
    %c0 = arith.constant 0 : index
    %c0_0 = arith.constant 0 : index
    %0 = vector.load %arg1[%c0, %c0_0] : memref<8x256xf32, #tpu.memory_space<vmem>>, vector<8x256xf32>
    %c0_1 = arith.constant 0 : index
    %c0_2 = arith.constant 0 : index
    %1 = vector.load %arg2[%c0_1, %c0_2] : memref<8x256xf32, #tpu.memory_space<vmem>>, vector<8x256xf32>
    %2 = arith.subf %0, %1 : vector<8x256xf32>
    %3 = arith.mulf %2, %2 : vector<8x256xf32>
    %c8_i32 = arith.constant 8 : i32
    %4 = arith.muli %arg0, %c8_i32 : i32
    %5 = tpu.iota {dimensions = array<i32: 0>} : vector<8x256xi32>
    %6 = vector.broadcast %4 : i32 to vector<8x256xi32>
    %7 = arith.addi %6, %5 : vector<8x256xi32>
    %c8_i32_3 = arith.constant 8 : i32
    %8 = vector.broadcast %c8_i32_3 : i32 to vector<8x256xi32>
    %9 = arith.cmpi slt, %7, %8 : vector<8x256xi32>
    %cst = arith.constant 0.000000e+00 : f32
    %10 = vector.broadcast %cst : f32 to vector<8x256xf32>
    %11 = arith.select %9, %3, %10 : vector<8x256xi1>, vector<8x256xf32>
    %cst_4 = arith.constant dense<0.000000e+00> : vector<256xf32>
    %12 = vector.multi_reduction <add>, %11, %cst_4 [0] : vector<8x256xf32> to vector<256xf32>
    %13 = vector.shape_cast %12 : vector<256xf32> to vector<1x256xf32>
    %c0_5 = arith.constant 0 : index
    %c0_6 = arith.constant 0 : index
    %14 = vector.load %arg3[%c0_5, %c0_6] : memref<1x256xf32, #tpu.memory_space<vmem>>, vector<1x256xf32>
    tpu.vector_store %arg3[%c0_5, %c0_6], %13 {strides = array<i32>} : memref<1x256xf32, #tpu.memory_space<vmem>>, vector<1x256xf32>,
    return
  }
  func.func @transform_0(%arg0: i32) -> (i32, i32) {
    %c0_i32 = arith.constant 0 : i32
    %c0_i32_0 = arith.constant 0 : i32
    return %arg0, %c0_i32 : i32, i32
  }
  func.func @transform_1(%arg0: i32) -> (i32, i32) {
    %c0_i32 = arith.constant 0 : i32
    %c0_i32_0 = arith.constant 0 : i32
    return %arg0, %c0_i32 : i32, i32
  }
  func.func @transform_2(%arg0: i32) -> (i32, i32) {
    %c0_i32 = arith.constant 0 : i32
    %c0_i32_0 = arith.constant 0 : i32
    return %arg0, %c0_i32 : i32, i32
  }
}

</mosaic_0001>

<bundles_post_ra>
// kernel: tpu_custom_call.1
= control target key start
LH: loop header
LB: loop body
LE: loop exit
PB: predicated region body
PF: predicated region fallthrough
CT: control target
= control target key end

     0   :  { %7 = vsyncpa [#allocation3], 0  ;;  %s234_s0 = inlined_call_operand.hbm [shape: f32[8,256], index: 0, kind: input, shape index: {}]   ;;  %s235_s1 = inlined_call_operand.hbm [shape: f32[8,256], index: 1, kind: input, shape index: {}]   ;;  %s236_s2 = inlined_call_operand.hbm [shape: f32[1,256], index: 2, kind: output, shape index: {}]  }
   0x1   :  { %8 = vsyncpa [#allocation6], 0 }
   0x2   :  { %9 = vsyncpa [#allocation4], 0  ;;  %s179_s9 = smov [#allocation2]   ;;  %s180_s11 = smov [#allocation5]  }
   0x3   :  { %s16_s10 = sshll.u32 %s179_s9, 4  ;;  %s26_s12 = sshll.u32 %s180_s11, 4  ;;  %s17_s10 = int_to_ptr.vmem [resolvable:$true] %s16_s10  ;;  %s27_s12 = int_to_ptr.vmem [resolvable:$true] %s26_s12 }
   0x4   :  { %s107_s15 = scalar_lea.hbm %s234_s0, 256 }
   0x5   :  { %p108_p0 = scmp.ne.s32.totalorder %s234_s0, %s107_s15  ;;  %p111_p1 = scmp.lt.u32.totalorder %s107_s15, %s234_s0 }
   0x7   :  { %p113_p2 = pnand %p111_p1, %p108_p0 }
   0x9   :  { %116 = shalt.err (!%p113_p2)
}
   0xa   :  { %s117_s20 = scalar_lea.vmem %s17_s10, 256  ;;  %p122_p4 = scmp.lt.s32.totalorder %s17_s10, %s17_s10 }
   0xb   :  { %p118_p3 = scmp.ne.s32.totalorder %s17_s10, %s117_s20  ;;  %p123_p5 = scmp.lt.s32.totalorder %s117_s20, %s117_s20 }
   0xd   :  { %p124_p6 = por %p123_p5, %p122_p4 }
   0xf   :  { %p125_p7 = pnand %p124_p6, %p118_p3 }
  0x11   :  { %128 = shalt.err (!%p125_p7)
}
  0x12   :  { %19 = dma.hbm_to_vmem [thread:$0]  %s234_s0, 256, %s17_s10, [#allocation3]  }
  0x13   :  { %s129_s25 = scalar_lea.hbm %s235_s1, 256 }
  0x14   :  { %p130_p8 = scmp.ne.s32.totalorder %s235_s1, %s129_s25  ;;  %p133_p9 = scmp.lt.u32.totalorder %s129_s25, %s235_s1 }
  0x16   :  { %p135_p10 = pnand %p133_p9, %p130_p8 }
  0x18   :  { %138 = shalt.err (!%p135_p10)
}
  0x19   :  { %s139_s30 = scalar_lea.vmem %s27_s12, 256  ;;  %p144_p12 = scmp.lt.s32.totalorder %s27_s12, %s27_s12 }
  0x1a   :  { %p140_p11 = scmp.ne.s32.totalorder %s27_s12, %s139_s30  ;;  %p145_p13 = scmp.lt.s32.totalorder %s139_s30, %s139_s30 }
  0x1c   :  { %p146_p0 = por %p145_p13, %p144_p12 }
  0x1e   :  { %p147_p1 = pnand %p146_p0, %p140_p11 }
  0x20   :  { %150 = shalt.err (!%p147_p1)
}
  0x21   :  { %29 = dma.hbm_to_vmem [thread:$0]  %s235_s1, 256, %s27_s12, [#allocation6]  }
  0x22   :  { %173 = dma.done.wait [#allocation3], 256  }
  0x23   :  { %174 = vsyncadd [#allocation3], 4294967040 }
  0x24   :  { %175 = dma.done.wait [#allocation6], 256  }
  0x25   :  { %176 = vsyncadd [#allocation6], 4294967040  ;;  %v36_v0 = vld [vmem:[#allocation2] sm:$0xff]  ;;  %v37_v1 = vld [vmem:[#allocation2 + $0x8] sm:$0xff]  ;;  %v181_v12 = vmov 1966171168   ;;  %v70_v14 = vlaneseq }
  0x26   :  { %v38_v2 = vld [vmem:[#allocation5] sm:$0xff]  ;;  %v39_v3 = vld [vmem:[#allocation5 + $0x8] sm:$0xff]  ;;  %v68_v13 = vunpack.c.l.s4 %v181_v12  ;;  %s182_s1 = smov [#allocation7]  }
  0x27   :  { %v40_v4 = vsub.f32 %v36_v0, %v38_v2  ;;  %v41_v5 = vsub.f32 %v37_v1, %v39_v3  ;;  %v71_v20 = vshrl.u32 %v70_v14, 7  ;;  %s93_s4 = sshll.u32 %s182_s1, 4  ;;  %vm84_vm0 = vcmp.lt.s32.totalorder %v70_v14, 256  ;;  %s94_s4 = int_to_ptr.vmem [resolvable:$true] %s93_s4 }
  0x28   :  { %v69_v19 = vunpack.c.0.s8 %v68_v13  ;;  %s151_s5 = scalar_lea.vmem %s94_s4, 32  ;;  %p156_p3 = scmp.lt.s32.totalorder %s94_s4, %s94_s4 }
  0x29   :  { %v42_v6 = vmul.f32 %v40_v4, %v40_v4  ;;  %v43_v7 = vmul.f32 %v41_v5, %v41_v5  ;;  %p152_p2 = scmp.ne.s32.totalorder %s94_s4, %s151_s5  ;;  %p157_p4 = scmp.lt.s32.totalorder %s151_s5, %s151_s5 }
  0x2a   :  { %v72_v25 = vsub.s32 %v69_v19, %v71_v20 }
  0x2b   :  { %v52_v8 = vrot.slane %v42_v6, 4  ;;  %v58_v9 = vrot.slane %v43_v7, 4  ;;  %p158_p5 = por %p157_p4, %p156_p3 }
  0x2d   :  { %v53_v10 = vadd.f32 %v52_v8, %v42_v6  ;;  %v59_v11 = vadd.f32 %v58_v9, %v43_v7  ;;  %p159_p6 = pnand %p158_p5, %p152_p2 }
  0x2f   :  { %v54_v15 = vrot.slane %v53_v10, 2  ;;  %v60_v16 = vrot.slane %v59_v11, 2 }
  0x31   :  { %v55_v17 = vadd.f32 %v54_v15, %v53_v10  ;;  %v61_v18 = vadd.f32 %v60_v16, %v59_v11 }
  0x33   :  { %v56_v21 = vrot.slane %v55_v17, 1  ;;  %v62_v22 = vrot.slane %v61_v18, 1 }
  0x35   :  { %v57_v23 = vadd.f32 %v56_v21, %v55_v17  ;;  %v63_v24 = vadd.f32 %v62_v22, %v61_v18 }
  0x37   :  { %v66_v26 = vcombine.low %v57_v23, %v63_v24 }
  0x39   :  { %v73_v27 = vrot.slane %v66_v26, %v72_v25 }
  0x3b   :  { %v80_v28 = vrot.slane %v73_v27, %v72_v25 }
  0x3d   :  { %86 = vst.msk [vmem:[#allocation7] sm:$0x3] %vm84_vm0, %v80_v28 }
  0x3e   :  { %162 = shalt.err (!%p159_p6)
}
  0x3f   :  { %s163_s8 = scalar_lea.hbm %s236_s2, 32 }
  0x40   :  { %p164_p7 = scmp.ne.s32.totalorder %s236_s2, %s163_s8  ;;  %p167_p8 = scmp.lt.u32.totalorder %s163_s8, %s236_s2 }
  0x42   :  { %p169_p9 = pnand %p167_p8, %p164_p7 }
  0x44   :  { %172 = shalt.err (!%p169_p9)
}
  0x45   :  { %96 = dma.vmem_to_hbm [thread:$0]  %s94_s4, 32, %s236_s2, [#allocation4]  }
  0x46   :  { %177 = dma.done.wait [#allocation4], 32  }
  0x47   :  { %178 = vsyncadd [#allocation4], 4294967264 }
  0x48   :  { %100 = vsyncpa [#allocation3], 1 }
  0x49   :  { %101 = vsyncpa [#allocation6], 1 }
  0x4a   :  { %102 = vsyncpa [#allocation4], 1 }

</bundles_post_ra>
